<compile_context>
chip_gen: v7x
topology: tpu7x:2x2x1
jax: 0.10.0
libtpu: 0.0.40
codegen_flags: <defaults>
</compile_context>

<pallas_src>
import math

import jax
import jax.numpy as jnp
from jax.experimental import pallas as pl
from jax.experimental.pallas import tpu as pltpu


def _round_up(x, m):
    return ((x + m - 1) // m) * m


# ---------------------------------------------------------------------------
# Kernel 1: ReLU -> hidden Conv1d layers -> im2col slab of the LAST conv
# layer's input (plus a ones row, so the last layer's bias can ride along the
# fused SetConv contraction in kernel 2).
# ---------------------------------------------------------------------------
def make_cnn_kernel(chans, K, L, L_al):
    n_layers = len(chans) - 1
    pad = K // 2
    assert K % 2 == 1, "'same' padding assumes odd kernel_size (as in the module)"
    assert L_al >= L + pad and L_al % 128 == 0
    n_hidden = n_layers - 1

    def build_slab(act):
        # act: [cin, L_al] f32, zero in columns [L:L_al].
        # slab[k*cin + ci, j] == act[ci, j + k - pad]  (zero when out of range),
        # realized with XLU lane rolls (zero tail supplies both halos).
        rows = []
        for k in range(K):
            shift = (pad - k) % L_al
            rows.append(act if shift == 0 else pltpu.roll(act, shift=shift, axis=1))
        return jnp.concatenate(rows, axis=0)

    def kernel(*refs):
        z_ref = refs[0]                                   # [C0, L_al] f32 (zero-padded)
        w_refs = refs[1:1 + n_hidden]                     # packed bf16 [cout, K*cin]
        b_refs = refs[1 + n_hidden:1 + 2 * n_hidden]      # [cout, 1] f32
        slab_out = refs[1 + 2 * n_hidden]                 # [K*chans[-2] + 1, L_al] bf16

        lane = jax.lax.broadcasted_iota(jnp.int32, (1, L_al), 1)
        valid = lane < L

        act = jnp.maximum(z_ref[...], 0.0)                # ReLU keeps the zero tail
        for i in range(n_hidden):
            slab = build_slab(act).astype(jnp.bfloat16)   # [K*cin, L_al]
            out = jnp.dot(w_refs[i][...], slab,
                          preferred_element_type=jnp.float32)   # one MXU matmul/layer
            out = out + b_refs[i][...]
            # ReLU between layers; re-zero the lane tail so the next layer's
            # rolled taps see proper 'same' padding.
            act = jnp.where(valid, jnp.maximum(out, 0.0), 0.0)

        slab_last = build_slab(act)                       # [K*cin_last, L_al] f32
        ones_row = jnp.ones((1, L_al), jnp.float32)       # carries the last-layer bias
        slab_out[...] = jnp.concatenate([slab_last, ones_row],
                                        axis=0).astype(jnp.bfloat16)

    return kernel


# ---------------------------------------------------------------------------
# Kernel 2: fused (last Conv1d layer + SetConv RBF interpolation), gridded over
# target-point tiles; output is lane-dense along targets.
# ---------------------------------------------------------------------------
def make_setconv_kernel(L, L_al, x_dim, inv_2ls2):
    def kernel(xt_ref, xg_ref, slab_ref, w_aug_ref, out_ref):
        # xt_ref:    [NT_TILE, x_dim] f32   (this tile's targets)
        # xg_ref:    [x_dim, L_al]    f32   (grid positions, zero-padded)
        # slab_ref:  [K*C_in + 1, L_al] bf16 (im2col of last conv input + ones row)
        # w_aug_ref: [out_mult, K*C_in + 1] f32 ([W_last | b_last])
        # out_ref:   [out_mult, NT_TILE] f32 (mean^T, targets on lanes)
        lane = jax.lax.broadcasted_iota(jnp.int32, (1, L_al), 1)
        valid = lane < L

        xt = xt_ref[...]                                   # hoisted load
        nt = xt.shape[0]
        d2 = jnp.zeros((nt, L_al), jnp.float32)
        for d in range(x_dim):                             # x_dim small; stays on VPU
            diff = xt[:, d:d + 1] - xg_ref[d:d + 1, :]     # [NT, L_al]
            d2 = d2 + diff * diff
        w_rbf = jnp.where(valid, jnp.exp(-inv_2ls2 * d2), 0.0)   # f32 exp (EUP)

        # M[r, t] = sum_l slab[r, l] * w_rbf[t, l]        -> [K*C_in+1, NT]
        m = jax.lax.dot_general(
            slab_ref[...], w_rbf.astype(jnp.bfloat16),
            dimension_numbers=(((1,), (1,)), ((), ())),
            preferred_element_type=jnp.float32)
        # mean^T = [W_last | b_last] @ M                   -> [out_mult, NT]
        out_ref[...] = jnp.dot(w_aug_ref[...], m,
                               preferred_element_type=jnp.float32)

    return kernel


# ---------------------------------------------------------------------------
# Wrapper: layout glue (packing / padding / transposes) + two pallas_calls.
# ---------------------------------------------------------------------------
def convcnp_decoder_forward(z_c, x_grid, x_t, weights, biases, *,
                            kernel_size, lengthscale, noise):
    """weights[i]: [C_out, C_in, K] (PyTorch Conv1d layout); biases[i]: [C_out]."""
    K = kernel_size
    pad = K // 2
    chans = [z_c.shape[0]] + [w.shape[0] for w in weights]
    n_layers = len(weights)
    L = z_c.shape[1]
    n_t, x_dim = x_t.shape
    out_mult = chans[-1]
    inv_2ls2 = 0.5 / float(lengthscale) ** 2

    L_al = _round_up(L + pad, 128)          # lane-aligned grid width (zero tail = halo)
    NT_TILE = 128
    nt_pad = _round_up(n_t, NT_TILE)

    # ---- glue: weight packing & zero padding (layout only, no compute hoisted) ----
    # [C_out, C_in, K] -> [C_out, K*C_in] so every layer is one matmul vs an im2col slab.
    packed = [jnp.transpose(w, (0, 2, 1)).reshape(w.shape[0], K * w.shape[1])
              for w in weights]
    w_hidden = [p.astype(jnp.bfloat16) for p in packed[:-1]]
    b_hidden = [b.reshape(-1, 1).astype(jnp.float32) for b in biases[:-1]]
    # Last layer folded into the SetConv: augment its weight with the bias column.
    w_last_aug = jnp.concatenate(
        [packed[-1], biases[-1].reshape(-1, 1)], axis=1).astype(jnp.float32)

    z_pad = jnp.zeros((chans[0], L_al), jnp.float32).at[:, :L].set(z_c)
    xg_pad = jnp.zeros((x_dim, L_al), jnp.float32).at[:, :L].set(x_grid.T)
    xt_pad = jnp.zeros((nt_pad, x_dim), jnp.float32).at[:n_t, :].set(x_t)

    kc1 = K * chans[n_layers - 1] + 1       # im2col rows of last conv input + ones row

    def vmem_spec():
        return pl.BlockSpec(memory_space=pltpu.MemorySpace.VMEM)

    # ---- call 1: ReLU + hidden conv layers -> im2col slab of last conv input ----
    cnn_kernel = make_cnn_kernel(tuple(chans), K, L, L_al)
    slab = pl.pallas_call(
        cnn_kernel,
        out_shape=jax.ShapeDtypeStruct((kc1, L_al), jnp.bfloat16),
        in_specs=[vmem_spec() for _ in range(1 + 2 * (n_layers - 1))],
        out_specs=vmem_spec(),
    )(z_pad, *w_hidden, *b_hidden)

    # ---- call 2: fused last conv + SetConv, parallel grid over target tiles ----
    setconv_kernel = make_setconv_kernel(L, L_al, x_dim, inv_2ls2)
    mean_t = pl.pallas_call(
        setconv_kernel,
        out_shape=jax.ShapeDtypeStruct((out_mult, nt_pad), jnp.float32),
        grid=(nt_pad // NT_TILE,),
        in_specs=[
            pl.BlockSpec((NT_TILE, x_dim), lambda i: (i, 0)),
            pl.BlockSpec((x_dim, L_al), lambda i: (0, 0)),
            pl.BlockSpec((kc1, L_al), lambda i: (0, 0)),
            pl.BlockSpec((out_mult, kc1), lambda i: (0, 0)),
        ],
        out_specs=pl.BlockSpec((out_mult, NT_TILE), lambda i: (0, i)),
        compiler_params=pltpu.CompilerParams(
            dimension_semantics=("parallel",)),
    )(xt_pad, xg_pad, slab, w_last_aug)

    mean = mean_t.T[:n_t]                   # [n_t, out_mult]  (glue transpose)
    std = jnp.full_like(mean, noise)
    # Likelihood is Normal(mean, noise); return its parameters (no torch Distribution).
    return mean, std


# ---------------------------------------------------------------------------
# Pure-JAX reference (f32, HIGHEST precision) for a sanity check.
# ---------------------------------------------------------------------------
def reference_forward(z_c, x_grid, x_t, weights, biases, *, lengthscale):
    hp = jax.lax.Precision.HIGHEST
    act = jnp.maximum(z_c, 0.0)[None]                        # [1, C0, L]
    for i, (w, b) in enumerate(zip(weights, biases)):
        act = jax.lax.conv_general_dilated(
            act, w, window_strides=(1,), padding="SAME",
            dimension_numbers=("NCH", "OIH", "NCH"), precision=hp)
        act = act + b[None, :, None]
        if i < len(weights) - 1:
            act = jnp.maximum(act, 0.0)
    z_proc = act[0]                                          # [out_mult, L]
    d2 = jnp.sum((x_t[:, None, :] - x_grid[None, :, :]) ** 2, axis=-1)
    w_rbf = jnp.exp(-0.5 * d2 / lengthscale ** 2)
    return jnp.matmul(w_rbf, z_proc.T, precision=hp)         # [n_t, out_mult]


if __name__ == "__main__":
    # Small, module-consistent shapes.
    x_dim = 1
    y_dim = 1
    embedded_dim = 16
    cnn_chans = [16, 16]
    out_dim_multiplier = 1          # NormalLikelihood(noise=0.1): fixed-noise Gaussian
    kernel_size = 5
    lengthscale = 0.01
    noise = 0.1
    L_grid = 64
    n_target = 32

    # cnn_chans[-1] != out_dim_multiplier -> append it, then prepend embedded_dim
    chans = [embedded_dim] + cnn_chans + [out_dim_multiplier]

    key = jax.random.PRNGKey(0)
    keys = jax.random.split(key, len(chans) + 1)

    weights, biases = [], []
    for i in range(len(chans) - 1):
        kw, kb = jax.random.split(keys[i])
        cin, cout = chans[i], chans[i + 1]
        bound = 1.0 / math.sqrt(cin * kernel_size)       # PyTorch-style uniform init
        weights.append(jax.random.uniform(
            kw, (cout, cin, kernel_size), jnp.float32, -bound, bound))
        biases.append(jax.random.uniform(kb, (cout,), jnp.float32, -bound, bound))

    z_c = jax.random.normal(keys[-2], (embedded_dim, L_grid), jnp.float32)
    x_grid = jnp.linspace(-2.0, 2.0, L_grid, dtype=jnp.float32).reshape(L_grid, x_dim)
    x_t = jax.random.uniform(keys[-1], (n_target, x_dim), jnp.float32, -2.0, 2.0)

    mean, std = convcnp_decoder_forward(
        z_c, x_grid, x_t, weights, biases,
        kernel_size=kernel_size, lengthscale=lengthscale, noise=noise)
    jax.block_until_ready((mean, std))

    assert mean.shape == (n_target, out_dim_multiplier * y_dim)
    assert std.shape == mean.shape
    assert bool(jnp.all(jnp.isfinite(mean)))

    ref = reference_forward(z_c, x_grid, x_t, weights, biases, lengthscale=lengthscale)
    # bf16 matmul inputs with f32 accumulation -> loose tolerance vs f32 reference.
    assert bool(jnp.allclose(mean, ref, atol=3e-2, rtol=1e-1)), \
        float(jnp.max(jnp.abs(mean - ref)))

    print("KERNEL_OK")
</pallas_src>

<mosaic_0001>
module attributes {stable_mosaic.version = 11 : i64} {
  func.func @kernel(%arg0: memref<16x128xf32, #tpu.memory_space<vmem>>, %arg1: memref<16x80xbf16, #tpu.memory_space<vmem>>, %arg2: memref<16x80xbf16, #tpu.memory_space<vmem>>, %arg3: memref<16x1xf32, #tpu.memory_space<vmem>>, %arg4: memref<16x1xf32, #tpu.memory_space<vmem>>, %arg5: memref<81x128xbf16, #tpu.memory_space<vmem>>) attributes {dimension_semantics = [], scalar_prefetch = 0 : i64, scratch_operands = 0 : i64, tpu.core_type = #tpu.core_type<tc>} {
    %0 = tpu.iota {dimensions = array<i32: 1>} : vector<1x128xi32>
    %c64_i32 = arith.constant 64 : i32
    %1 = vector.broadcast %c64_i32 : i32 to vector<1x128xi32>
    %2 = arith.cmpi slt, %0, %1 : vector<1x128xi32>
    %c0 = arith.constant 0 : index
    %c0_0 = arith.constant 0 : index
    %3 = vector.load %arg0[%c0, %c0_0] : memref<16x128xf32, #tpu.memory_space<vmem>>, vector<16x128xf32>
    %cst = arith.constant 0.000000e+00 : f32
    %4 = vector.broadcast %cst : f32 to vector<16x128xf32>
    %5 = arith.maximumf %3, %4 : vector<16x128xf32>
    %c2_i32 = arith.constant 2 : i32
    %6 = tpu.dynamic_rotate %5 by %c2_i32 dim 1 : vector<16x128xf32>, i32 -> vector<16x128xf32>
    %c1_i32 = arith.constant 1 : i32
    %7 = tpu.dynamic_rotate %5 by %c1_i32 dim 1 : vector<16x128xf32>, i32 -> vector<16x128xf32>
    %c127_i32 = arith.constant 127 : i32
    %8 = tpu.dynamic_rotate %5 by %c127_i32 dim 1 : vector<16x128xf32>, i32 -> vector<16x128xf32>
    %c126_i32 = arith.constant 126 : i32
    %9 = tpu.dynamic_rotate %5 by %c126_i32 dim 1 : vector<16x128xf32>, i32 -> vector<16x128xf32>
    %10 = tpu.concatenate %6, %7, %5, %8, %9 in 0 : vector<16x128xf32>, vector<16x128xf32>, vector<16x128xf32>, vector<16x128xf32>, vector<16x128xf32> -> vector<80x128xf32>
    %11 = arith.truncf %10 : vector<80x128xf32> to vector<80x128xbf16>
    %c0_1 = arith.constant 0 : index
    %c0_2 = arith.constant 0 : index
    %12 = vector.load %arg1[%c0_1, %c0_2] : memref<16x80xbf16, #tpu.memory_space<vmem>>, vector<16x80xbf16>
    %cst_3 = arith.constant dense<0.000000e+00> : vector<16x128xf32>
    %13 = tpu.matmul %12, %11, %cst_3 {dimension_numbers = #tpu.dot_dimension_numbers<[1], [0], [0], [1], [0, 0, 1, 1], [], []>} : vector<16x80xbf16>, vector<80x128xbf16>, vector<16x128xf32> -> vector<16x128xf32>
    %c0_4 = arith.constant 0 : index
    %c0_5 = arith.constant 0 : index
    %14 = vector.load %arg3[%c0_4, %c0_5] : memref<16x1xf32, #tpu.memory_space<vmem>>, vector<16x1xf32>
    %15 = vector.broadcast %14 : vector<16x1xf32> to vector<16x128xf32>
    %16 = arith.addf %13, %15 : vector<16x128xf32>
    %cst_6 = arith.constant 0.000000e+00 : f32
    %17 = vector.broadcast %cst_6 : f32 to vector<16x128xf32>
    %18 = arith.maximumf %16, %17 : vector<16x128xf32>
    %cst_7 = arith.constant 0.000000e+00 : f32
    %19 = vector.shape_cast %2 : vector<1x128xi1> to vector<1x128xi1>
    %20 = vector.broadcast %19 : vector<1x128xi1> to vector<16x128xi1>
    %21 = vector.broadcast %cst_7 : f32 to vector<16x128xf32>
    %22 = arith.select %20, %18, %21 : vector<16x128xi1>, vector<16x128xf32>
    %c2_i32_8 = arith.constant 2 : i32
    %23 = tpu.dynamic_rotate %22 by %c2_i32_8 dim 1 : vector<16x128xf32>, i32 -> vector<16x128xf32>
    %c1_i32_9 = arith.constant 1 : i32
    %24 = tpu.dynamic_rotate %22 by %c1_i32_9 dim 1 : vector<16x128xf32>, i32 -> vector<16x128xf32>
    %c127_i32_10 = arith.constant 127 : i32
    %25 = tpu.dynamic_rotate %22 by %c127_i32_10 dim 1 : vector<16x128xf32>, i32 -> vector<16x128xf32>
    %c126_i32_11 = arith.constant 126 : i32
    %26 = tpu.dynamic_rotate %22 by %c126_i32_11 dim 1 : vector<16x128xf32>, i32 -> vector<16x128xf32>
    %27 = tpu.concatenate %23, %24, %22, %25, %26 in 0 : vector<16x128xf32>, vector<16x128xf32>, vector<16x128xf32>, vector<16x128xf32>, vector<16x128xf32> -> vector<80x128xf32>
    %28 = arith.truncf %27 : vector<80x128xf32> to vector<80x128xbf16>
    %c0_12 = arith.constant 0 : index
    %c0_13 = arith.constant 0 : index
    %29 = vector.load %arg2[%c0_12, %c0_13] : memref<16x80xbf16, #tpu.memory_space<vmem>>, vector<16x80xbf16>
    %cst_14 = arith.constant dense<0.000000e+00> : vector<16x128xf32>
    %30 = tpu.matmul %29, %28, %cst_14 {dimension_numbers = #tpu.dot_dimension_numbers<[1], [0], [0], [1], [0, 0, 1, 1], [], []>} : vector<16x80xbf16>, vector<80x128xbf16>, vector<16x128xf32> -> vector<16x128xf32>
    %c0_15 = arith.constant 0 : index
    %c0_16 = arith.constant 0 : index
    %31 = vector.load %arg4[%c0_15, %c0_16] : memref<16x1xf32, #tpu.memory_space<vmem>>, vector<16x1xf32>
    %32 = vector.broadcast %31 : vector<16x1xf32> to vector<16x128xf32>
    %33 = arith.addf %30, %32 : vector<16x128xf32>
    %cst_17 = arith.constant 0.000000e+00 : f32
    %34 = vector.broadcast %cst_17 : f32 to vector<16x128xf32>
    %35 = arith.maximumf %33, %34 : vector<16x128xf32>
    %cst_18 = arith.constant 0.000000e+00 : f32
    %36 = vector.shape_cast %2 : vector<1x128xi1> to vector<1x128xi1>
    %37 = vector.broadcast %36 : vector<1x128xi1> to vector<16x128xi1>
    %38 = vector.broadcast %cst_18 : f32 to vector<16x128xf32>
    %39 = arith.select %37, %35, %38 : vector<16x128xi1>, vector<16x128xf32>
    %c2_i32_19 = arith.constant 2 : i32
    %40 = tpu.dynamic_rotate %39 by %c2_i32_19 dim 1 : vector<16x128xf32>, i32 -> vector<16x128xf32>
    %c1_i32_20 = arith.constant 1 : i32
    %41 = tpu.dynamic_rotate %39 by %c1_i32_20 dim 1 : vector<16x128xf32>, i32 -> vector<16x128xf32>
    %c127_i32_21 = arith.constant 127 : i32
    %42 = tpu.dynamic_rotate %39 by %c127_i32_21 dim 1 : vector<16x128xf32>, i32 -> vector<16x128xf32>
    %c126_i32_22 = arith.constant 126 : i32
    %43 = tpu.dynamic_rotate %39 by %c126_i32_22 dim 1 : vector<16x128xf32>, i32 -> vector<16x128xf32>
    %44 = tpu.concatenate %40, %41, %39, %42, %43 in 0 : vector<16x128xf32>, vector<16x128xf32>, vector<16x128xf32>, vector<16x128xf32>, vector<16x128xf32> -> vector<80x128xf32>
    %cst_23 = arith.constant 1.000000e+00 : f32
    %45 = vector.broadcast %cst_23 : f32 to vector<1x128xf32>
    %46 = tpu.concatenate %44, %45 in 0 : vector<80x128xf32>, vector<1x128xf32> -> vector<81x128xf32>
    %47 = arith.truncf %46 : vector<81x128xf32> to vector<81x128xbf16>
    %c0_24 = arith.constant 0 : index
    %c0_25 = arith.constant 0 : index
    %48 = vector.load %arg5[%c0_24, %c0_25] : memref<81x128xbf16, #tpu.memory_space<vmem>>, vector<81x128xbf16>
    tpu.vector_store %arg5[%c0_24, %c0_25], %47 {strides = array<i32>} : memref<81x128xbf16, #tpu.memory_space<vmem>>, vector<81x128xbf16>,
    return
  }
}

</mosaic_0001>

<bundles_post_ra>
// kernel: tpu_custom_call.1
= control target key start
LH: loop header
LB: loop body
LE: loop exit
PB: predicated region body
PF: predicated region fallthrough
CT: control target
= control target key end

     0   :  { %v497_v4 = vmov 0.0   ;;  %s614_s0 = inlined_call_operand.vmem [shape: f32[16,128], index: 0, kind: input, shape index: {}]   ;;  %s615_s1 = inlined_call_operand.vmem [shape: bf16[16,80], index: 1, kind: input, shape index: {}]   ;;  %s616_s2 = inlined_call_operand.vmem [shape: bf16[16,80], index: 2, kind: input, shape index: {}]   ;;  %s617_s3 = inlined_call_operand.vmem [shape: f32[16,1], index: 3, kind: input, shape index: {}]   ;;  %s618_s4 = inlined_call_operand.vmem [shape: f32[16,1], index: 4, kind: input, shape index: {}]   ;;  %s619_s5 = inlined_call_operand.hbm [shape: bf16[81,128], index: 5, kind: output, shape index: {}]  }
   0x1   :  { %v25_v0 = vld [vmem:[%s614_s0] sm:$0xff]  ;;  %v26_v1 = vld [vmem:[%s614_s0 + $0x8] sm:$0xff]  ;;  %370 = vmatprep.subr.bf16.mxu0 %v497_v4  ;;  %384 = vmatprep.subr.bf16.mxu1 %v497_v4 }
   0x2   :  { %v27_v2 = vmax.f32 %v25_v0, 0.0  ;;  %v28_v3 = vmax.f32 %v26_v1, 0.0 }
   0x4   :  { %v409_v5 = vpack.i.bf16 %v28_v3, %v27_v2 }
   0x5   :  { %10 = vsyncpa [#allocation3], 0  ;;  %v47_v6 = vpack.c.bf16 %v28_v3, %v27_v2  ;;  %s498_s22 = smov 2   ;;  %s499_s23 = smov 127   ;;  %vm502_vm0 = vmmov 0   ;;  %v52_v7 = vld [vmem:[%s617_s3] sm:$0xff]  ;;  %v22_v27 = vlaneseq }
   0x6   :  { %410 = vrot.lane.b32.xlu0 %v409_v5, %s498_s22  ;;  %420 = vrot.lane.b32.xlu1 %v409_v5, %s499_s23  ;;  %s500_s24 = smov 1   ;;  %s501_s0 = smov 126   ;;  %v53_v8 = vld [vmem:[%s617_s3 + $0x8] sm:$0xff]  ;;  %v503_v9 = vmov 0   ;;  %v471_v26 = vld [vmem:[%s615_s1] sm:$0xff]   ;;  %vm69_vm1 = vcmask 654336  }
   0x7   :  { %380 = vmatprep.mubr.msk.bf16.mxu0 %vm502_vm0, %v497_v4  ;;  %394 = vmatprep.mubr.msk.bf16.mxu1 %vm502_vm0, %v497_v4  ;;  %v566_v29 = vand.u32 127, %v22_v27  ;;  %v144_v43 = vld [vmem:[%s618_s4 + $0x8] sm:$0xff]  ;;  %v143_v44 = vld [vmem:[%s618_s4] sm:$0xff]  ;;  %vm279_vm4 = vcmask 1040384   ;;  %vm280_vm5 = vsmask.f32 256 }
   0x8   :  { %429 = vset.pattern.permute.xlu0 %v503_v9  ;;  %430 = vset.pattern.permute.xlu1 %v503_v9  ;;  %v472_v61 = vld [vmem:[%s616_s2] sm:$0xff]   ;;  %vm281_vm6 = vmand %vm279_vm4, %vm280_vm5  ;;  %s505_s2 = smov [#allocation2]  }
   0x9   :  { %vm24_vm2 = vcmp.lt.s32.totalorder %v566_v29, 64  ;;  %s290_s9 = sshll.u32 %s505_s2, 4  ;;  %s291_s9 = int_to_ptr.vmem [resolvable:$true] %s290_s9 }
   0xa   :  { %415 = vrot.lane.b32.xlu0 %v409_v5, %s500_s24  ;;  %425 = vrot.lane.b32.xlu1 %v409_v5, %s501_s0  ;;  %vm304_vm3 = vmpackc.low %vm24_vm2, %vm24_vm2  ;;  %s473_s10 = scalar_lea.vmem %s291_s9, 704  ;;  %p478_p1 = scmp.lt.s32.totalorder %s291_s9, %s291_s9 }
   0xb   :  { %p474_p0 = scmp.ne.s32.totalorder %s291_s9, %s473_s10  ;;  %p479_p2 = scmp.lt.s32.totalorder %s473_s10, %s473_s10 }
   0xd   :  { %p480_p3 = por %p479_p2, %p478_p1 }
   0xe   :  { %56 = vperm.xlu0 %429, %v52_v7   ;;  %61 = vperm.xlu1 %430, %v53_v8   ;;  %v504_v8 = vmov 1.0|1.0  }
   0xf   :  { %v318_v9 = vcombine.low %v504_v8, %v504_v8  ;;  %p481_p4 = pnand %p480_p3, %p474_p0 }
  0x78   :  { %v411_v10 = vpop.permute.xlu0 %410  ;;  %v421_v15 = vpop.permute.xlu1 %420 }
  0x79   :  { %v413_v11 = vunpack.i.h.bf16 %v411_v10  ;;  %v412_v12 = vunpack.i.l.bf16 %v411_v10  ;;  %v423_v19 = vunpack.i.h.bf16 %v421_v15  ;;  %v422_v20 = vunpack.i.l.bf16 %v421_v15 }
  0x7b   :  { %v45_v13 = vpack.c.bf16 %v413_v11, %v412_v12  ;;  %v48_v22 = vpack.c.bf16 %v423_v19, %v422_v20 }
  0x7c   :  { %v416_v14 = vpop.permute.xlu0 %415  ;;  %v426_v21 = vpop.permute.xlu1 %425 }
  0x7d   :  { %v418_v16 = vunpack.i.h.bf16 %v416_v14  ;;  %v417_v17 = vunpack.i.l.bf16 %v416_v14  ;;  %371 = vmatpush3.bf16.msra.mxu0 %v45_v13  ;;  %v428_v23 = vunpack.i.h.bf16 %v426_v21  ;;  %v427_v24 = vunpack.i.l.bf16 %v426_v21 }
  0x7e   :  { %372 = vmatprep.subr.bf16.mxu0 %v497_v4 }
  0x7f   :  { %v46_v18 = vpack.c.bf16 %v418_v16, %v417_v17  ;;  %v49_v25 = vpack.c.bf16 %v428_v23, %v427_v24 }
  0x81   :  { %373 = vmatpush3.bf16.msra.mxu0 %v46_v18 }
  0x82   :  { %374 = vmatprep.subr.bf16.mxu0 %v497_v4 }
  0x85   :  { %375 = vmatpush3.bf16.msra.mxu0 %v47_v6 }
  0x86   :  { %376 = vmatprep.subr.bf16.mxu0 %v497_v4 }
  0x89   :  { %377 = vmatpush3.bf16.msra.mxu0 %v48_v22 }
  0x8a   :  { %378 = vmatprep.subr.bf16.mxu0 %v497_v4 }
  0x8d   :  { %379 = vmatpush3.bf16.msra.mxu0 %v49_v25  ;;  %v57_v28 = vpop.permute.xlu0 %56  ;;  %v62_v31 = vpop.permute.xlu1 %61 }
  0x90   :  { %381 = vmatmul.mubr.msk.bf16.vlgmr.msra.gmra.mrb[0].mxu0 %vm69_vm1, %v471_v26 }
 0x163   :  { %v107_v30 = vpop.f32.mrb[0].mxu0 }
 0x164   :  { %v108_v32 = vadd.f32 %v107_v30, %v57_v28  ;;  %v382_v33 = vpop.f32.mrb[1].mxu0 }
 0x165   :  { %v110_v34 = vpop.f32.mrb[2].mxu0 }
 0x166   :  { %v114_v35 = vmax.f32 %v108_v32, 0.0  ;;  %v111_v36 = vadd.f32 %v110_v34, %v62_v31  ;;  %v383_v37 = vpop.f32.mrb[3].mxu0 }
 0x168   :  { %v115_v38 = vmax.f32 %v111_v36, 0.0  ;;  %v118_v39 = vsel %vm24_vm2, %v114_v35, 0.0 }
 0x16a   :  { %v119_v40 = vsel %vm24_vm2, %v115_v38, 0.0  ;;  %v305_v41 = vpack.c.bf16 %v115_v38, %v114_v35 }
 0x16b   :  { %v436_v42 = vpack.i.bf16 %v119_v40, %v118_v39 }
 0x16d   :  { %437 = vrot.lane.b32.xlu0 %v436_v42, %s500_s24  ;;  %432 = vrot.lane.b32.xlu1 %v436_v42, %s498_s22 }
 0x171   :  { %447 = vrot.lane.b32.xlu0 %v436_v42, %s501_s0  ;;  %442 = vrot.lane.b32.xlu1 %v436_v42, %s499_s23 }
 0x175   :  { %152 = vperm.xlu0 %429, %v144_v43   ;;  %147 = vperm.xlu1 %430, %v143_v44  }
 0x1df   :  { %v438_v45 = vpop.permute.xlu0 %437  ;;  %v433_v46 = vpop.permute.xlu1 %432 }
 0x1e0   :  { %v435_v47 = vunpack.i.h.bf16 %v433_v46  ;;  %v434_v48 = vunpack.i.l.bf16 %v433_v46  ;;  %v440_v49 = vunpack.i.h.bf16 %v438_v45  ;;  %v439_v50 = vunpack.i.l.bf16 %v438_v45 }
 0x1e2   :  { %v136_v51 = vpack.c.bf16 %v435_v47, %v434_v48  ;;  %v137_v52 = vpack.c.bf16 %v440_v49, %v439_v50 }
 0x1e3   :  { %v443_v53 = vpop.permute.xlu1 %442  ;;  %v448_v56 = vpop.permute.xlu0 %447 }
 0x1e4   :  { %385 = vmatpush3.bf16.msra.mxu1 %v136_v51  ;;  %v445_v54 = vunpack.i.h.bf16 %v443_v53  ;;  %v444_v55 = vunpack.i.l.bf16 %v443_v53  ;;  %v450_v57 = vunpack.i.h.bf16 %v448_v56  ;;  %v449_v58 = vunpack.i.l.bf16 %v448_v56 }
 0x1e5   :  { %386 = vmatprep.subr.bf16.mxu1 %v497_v4 }
 0x1e6   :  { %v139_v59 = vpack.c.bf16 %v445_v54, %v444_v55  ;;  %v140_v60 = vpack.c.bf16 %v450_v57, %v449_v58 }
 0x1e8   :  { %387 = vmatpush3.bf16.msra.mxu1 %v137_v52 }
 0x1e9   :  { %388 = vmatprep.subr.bf16.mxu1 %v497_v4 }
 0x1ec   :  { %389 = vmatpush3.bf16.msk.msra.mxu1 %vm304_vm3, %v305_v41 }
 0x1ed   :  { %390 = vmatprep.subr.bf16.mxu1 %v497_v4 }
 0x1f0   :  { %391 = vmatpush3.bf16.msra.mxu1 %v139_v59 }
 0x1f1   :  { %392 = vmatprep.subr.bf16.mxu1 %v497_v4  ;;  %v282_v4 = vld [vmem:[#allocation2 + $0x28] sm:$0x1] }
 0x1f2   :  { %v283_v11 = vsel %vm281_vm6, %v318_v9, %v282_v4 }
 0x1f3   :  { %284 = vst [vmem:[#allocation2 + $0x28] sm:$0x1] %v283_v11 }
 0x1f4   :  { %393 = vmatpush3.bf16.msra.mxu1 %v140_v60  ;;  %v148_v62 = vpop.permute.xlu1 %147  ;;  %v153_v2 = vpop.permute.xlu0 %152 }
 0x1f7   :  { %395 = vmatmul.mubr.msk.bf16.vlgmr.msra.gmra.mrb[0].mxu1 %vm69_vm1, %v472_v61 }
 0x2ca   :  { %v197_v63 = vpop.f32.mrb[0].mxu1 }
 0x2cb   :  { %v198_v0 = vadd.f32 %v197_v63, %v148_v62  ;;  %v396_v1 = vpop.f32.mrb[1].mxu1 }
 0x2cc   :  { %v200_v3 = vpop.f32.mrb[2].mxu1 }
 0x2cd   :  { %v204_v5 = vmax.f32 %v198_v0, 0.0  ;;  %v201_v6 = vadd.f32 %v200_v3, %v153_v2  ;;  %v397_v7 = vpop.f32.mrb[3].mxu1 }
 0x2cf   :  { %v205_v10 = vmax.f32 %v201_v6, 0.0  ;;  %v206_v12 = vsel %vm24_vm2, %v204_v5, 0.0 }
 0x2d1   :  { %v207_v13 = vsel %vm24_vm2, %v205_v10, 0.0 }
 0x2d2   :  { %v342_v14 = vpack.c.bf16 %v207_v13, %v206_v12  ;;  %v456_v15 = vpack.i.bf16 %v207_v13, %v206_v12 }
 0x2d4   :  { %355 = vst [vmem:[#allocation2 + $0x10] sm:$0xff] %v342_v14   ;;  %457 = vrot.lane.b32.xlu0 %v456_v15, %s500_s24  ;;  %452 = vrot.lane.b32.xlu1 %v456_v15, %s498_s22 }
 0x2d8   :  { %467 = vrot.lane.b32.xlu0 %v456_v15, %s501_s0  ;;  %462 = vrot.lane.b32.xlu1 %v456_v15, %s499_s23 }
 0x346   :  { %v458_v16 = vpop.permute.xlu0 %457  ;;  %v453_v17 = vpop.permute.xlu1 %452 }
 0x347   :  { %v460_v18 = vunpack.i.h.bf16 %v458_v16  ;;  %v459_v19 = vunpack.i.l.bf16 %v458_v16  ;;  %v455_v20 = vunpack.i.h.bf16 %v453_v17  ;;  %v454_v21 = vunpack.i.l.bf16 %v453_v17 }
 0x349   :  { %v337_v22 = vpack.c.bf16 %v460_v18, %v459_v19  ;;  %v332_v23 = vpack.c.bf16 %v455_v20, %v454_v21 }
 0x34a   :  { %v468_v24 = vpop.permute.xlu0 %467  ;;  %v463_v25 = vpop.permute.xlu1 %462 }
 0x34b   :  { %354 = vst [vmem:[#allocation2 + $0x8] sm:$0xff] %v337_v22   ;;  %333 = vst [vmem:[#allocation2] sm:$0xff] %v332_v23   ;;  %v470_v26 = vunpack.i.h.bf16 %v468_v24  ;;  %v469_v27 = vunpack.i.l.bf16 %v468_v24  ;;  %v465_v28 = vunpack.i.h.bf16 %v463_v25  ;;  %v464_v29 = vunpack.i.l.bf16 %v463_v25 }
 0x34d   :  { %v352_v30 = vpack.c.bf16 %v470_v26, %v469_v27  ;;  %v347_v31 = vpack.c.bf16 %v465_v28, %v464_v29 }
 0x34f   :  { %357 = vst [vmem:[#allocation2 + $0x20] sm:$0xff] %v352_v30   ;;  %356 = vst [vmem:[#allocation2 + $0x18] sm:$0xff] %v347_v31  }
 0x350   :  { %484 = shalt.err (!%p481_p4)
}
 0x351   :  { %s485_s13 = scalar_lea.hbm %s619_s5, 704 }
 0x352   :  { %p486_p5 = scmp.ne.s32.totalorder %s619_s5, %s485_s13  ;;  %p489_p6 = scmp.lt.u32.totalorder %s485_s13, %s619_s5 }
 0x354   :  { %p491_p7 = pnand %p489_p6, %p486_p5 }
 0x356   :  { %494 = shalt.err (!%p491_p7)
}
 0x357   :  { %s506_s18 = smov 64   ;;  %s507_s19 = smov 4  }
 0x358   :  { %296 = dma.vmem_to_hbm [thread:$0]  %s291_s9, 704, %s619_s5, [#allocation3], %s506_s18, %s506_s18, %s507_s19  }
 0x359   :  { %495 = dma.done.wait [#allocation3], 704  }
 0x35a   :  { %496 = vsyncadd [#allocation3], 4294966592 }
 0x35b   :  { %300 = vsyncpa [#allocation3], 1 }

</bundles_post_ra>
